<compile_context>
chip_gen: v7x
topology: tpu7x:2x2x1
jax: 0.10.0
libtpu: 0.0.40
codegen_flags: <defaults>
</compile_context>

<pallas_src>
import functools

import jax
import jax.numpy as jnp
from jax.experimental import pallas as pl
from jax.experimental.pallas import tpu as pltpu

LANE = 128


def _round_up(x, m):
    return ((x + m - 1) // m) * m


def _cdiv(a, b):
    return -(-a // b)


# ---------------------------------------------------------------------------
# Single-buffering for grid-constant operands: their index_map never changes,
# so the second pipeline buffer is never refilled -- Buffered(1) frees that
# VMEM.  Guarded so the script still runs on jax builds without pipeline_mode.
# ---------------------------------------------------------------------------
def _const_spec(block_shape, index_map):
    try:
        return pl.BlockSpec(block_shape, index_map,
                            pipeline_mode=pl.Buffered(buffer_count=1))
    except Exception:   # pragma: no cover - fall back to default double buffer
        return pl.BlockSpec(block_shape, index_map)


# ---------------------------------------------------------------------------
# In-kernel helpers
# ---------------------------------------------------------------------------
def _gate_weights(x_f32, gate_w, gate_b, threshold):
    """Exact-f32 gate: softmax -> (>= threshold) -> renormalize."""
    logits = jnp.dot(x_f32, gate_w, preferred_element_type=jnp.float32) + gate_b
    m = jnp.max(logits, axis=-1, keepdims=True)
    ex = jnp.exp(logits - m)
    probs = ex / jnp.sum(ex, axis=-1, keepdims=True)
    selected = (probs >= threshold).astype(jnp.float32)
    w = probs * selected
    wsum = jnp.sum(w, axis=-1, keepdims=True)
    wsum = jnp.where(wsum == 0.0, jnp.ones_like(wsum), wsum)
    # Exact divide: wsum is only (TM, 1), so this is a handful of ops on an
    # otherwise idle unit; the approximate reciprocal bought nothing.
    return w / wsum


def _tree_sum(terms):
    """Pairwise reduction: halves the dependent-VALU chain vs a serial sum."""
    terms = list(terms)
    while len(terms) > 1:
        nxt = [a + b for a, b in zip(terms[0::2], terms[1::2])]
        if len(terms) % 2:
            nxt.append(terms[-1])
        terms = nxt
    return terms[0]


# ---------------------------------------------------------------------------
# Kernel A: expert stack fully VMEM-resident (1-D token grid)
# ---------------------------------------------------------------------------
def _moe_kernel_resident(x_ref, wg_ref, bg_ref, we_ref, out_ref, *,
                         threshold, num_experts, d_out_pad, matmul_dtype):
    x = x_ref[...]
    # Gate stays f32 end-to-end so (probs >= threshold) matches the reference
    # bit-exactly regardless of the expert-matmul compute dtype.
    w = _gate_weights(x.astype(jnp.float32), wg_ref[...], bg_ref[...], threshold)

    # All experts in ONE lane-dense MXU matmul (TM, D) @ (D, E*D_out_pad);
    # in-kernel cast to the MXU dtype (bf16 by default), f32 accumulation.
    # (Gate fusion into this matmul is skipped on purpose: the gate must stay
    #  f32 while the weights are bf16 by default.)
    all_outs = jnp.dot(x.astype(matmul_dtype), we_ref[...],
                       preferred_element_type=jnp.float32)

    # Weighted combine over the E column groups.  d_out_pad is a multiple of
    # 128 so every slice is a lane-aligned view; pairwise tree add.
    terms = [w[:, e:e + 1] * all_outs[:, e * d_out_pad:(e + 1) * d_out_pad]
             for e in range(num_experts)]
    out_ref[...] = _tree_sum(terms).astype(out_ref.dtype)


# ---------------------------------------------------------------------------
# Kernel B: expert-blocked reduction axis (2-D grid: tokens x expert blocks)
# ---------------------------------------------------------------------------
def _moe_kernel_blocked(x_ref, wg_ref, bg_ref, we_ref, out_ref, w_scr, acc_scr, *,
                        threshold, experts_per_block, d_out_pad, matmul_dtype):
    j = pl.program_id(1)   # expert-block ("arbitrary") reduction axis

    @pl.when(j == 0)
    def _():
        # Gate computed once per token tile, stashed in VMEM scratch.
        w_scr[...] = _gate_weights(x_ref[...].astype(jnp.float32),
                                   wg_ref[...], bg_ref[...], threshold)
        acc_scr[...] = jnp.zeros_like(acc_scr)

    # This expert block's slice of the big matmul: (TM, D) @ (D, eblk*D_out_pad).
    partial = jnp.dot(x_ref[...].astype(matmul_dtype), we_ref[...],
                      preferred_element_type=jnp.float32)

    w = w_scr[...]                                          # (TM, E) f32
    lane = jax.lax.broadcasted_iota(jnp.int32, w.shape, 1)  # expert id per lane
    terms = []
    for t in range(experts_per_block):
        expert_id = j * experts_per_block + t               # dynamic global id
        wt = jnp.sum(jnp.where(lane == expert_id, w, 0.0), axis=-1, keepdims=True)
        terms.append(wt * partial[:, t * d_out_pad:(t + 1) * d_out_pad])
    acc_scr[...] += _tree_sum(terms)

    @pl.when(j == pl.num_programs(1) - 1)
    def _():
        out_ref[...] = acc_scr[...].astype(out_ref.dtype)


# ---------------------------------------------------------------------------
# Host-side planning / packing
# ---------------------------------------------------------------------------
def _vmem_capacity_bytes():
    # Generation-aware per-TensorCore VMEM (v5e/v6e: 128 MiB, v7x: 64 MiB/TC).
    try:
        cap = getattr(pltpu.get_tpu_info(), "vmem_capacity_bytes", None)
        if cap:
            return int(cap)
    except Exception:
        pass
    return 64 * 2 ** 20   # conservative fallback, safe on every generation


def _plan_tiles(n_tokens, d, d_out_pad, num_experts, x_bpe, w_bpe, out_bpe,
                tile_m_req, experts_per_block=None):
    """Pick (token tile, experts per weight block) under a per-TC VMEM budget.

    Counts: single-buffered gate, weight block (1 buffer if resident, 2 if
    expert-blocked), double-buffered token/output streams, the f32
    (TM, eblk*D_out_pad) matmul result + combine temporaries, and the blocked
    path's f32 accumulator / gate scratch.
    """
    cap = _vmem_capacity_bytes()
    budget = int(cap * 0.45)   # per-TC working-set budget (~0.4-0.5x capacity)

    def usage(tm, eblk, n_eblk):
        gate = (d * num_experts + num_experts) * 4
        weights = (1 if n_eblk == 1 else 2) * d * eblk * d_out_pad * w_bpe
        streams = 2 * tm * d * x_bpe + 2 * tm * d_out_pad * out_bpe
        inter = 2 * tm * eblk * d_out_pad * 4 + 4 * tm * num_experts * 4
        scratch = (tm * d_out_pad * 4 + tm * num_experts * 4) if n_eblk > 1 else 0
        return gate + weights + streams + inter + scratch

    tm_max = max(8, _round_up(min(tile_m_req, max(n_tokens, 1)), 8))
    tms, t = [], tm_max
    while True:
        tms.append(t)
        if t <= 8:
            break
        t = max(8, _round_up(t // 2, 8))
    tm_floor = min(128, tm_max)   # keep MXU-sized token tiles unless truly forced

    if experts_per_block is not None:
        eblk_candidates = [max(1, min(experts_per_block, num_experts))]
    else:
        eblk_candidates = sorted(
            (e for e in range(1, num_experts + 1) if num_experts % e == 0),
            reverse=True)

    for eblk in eblk_candidates:
        n_eblk = _cdiv(num_experts, eblk)
        for tm in tms:
            if tm < tm_floor and eblk != eblk_candidates[-1]:
                break   # prefer blocking experts over shrinking below an MXU tile
            if usage(tm, eblk, n_eblk) <= budget:
                return tm, eblk, n_eblk, usage(tm, eblk, n_eblk), cap
    eblk = eblk_candidates[-1]
    n_eblk = _cdiv(num_experts, eblk)
    return 8, eblk, n_eblk, usage(8, eblk, n_eblk), cap


def prepare_moe_params(gate_w, gate_b, expert_w, compute_dtype=jnp.bfloat16):
    """One-time host-side repack (hoist out of the forward path / cache at init).

    gate_w:   (D, E)         gate Linear weight (x @ W layout)
    gate_b:   (E,)           gate Linear bias
    expert_w: (E, D, D_out)  stacked linear expert weights
    compute_dtype: MXU dtype for the expert matmul (bf16 default; pass
        jnp.float32 for the exact path).  The gate / threshold selection is
        always computed in f32 regardless.
    """
    d, num_experts = gate_w.shape
    e2, d2, d_out = expert_w.shape
    assert e2 == num_experts and d2 == d
    d_out_pad = _round_up(d_out, LANE)
    we = expert_w
    if d_out_pad != d_out:
        # Pad every expert's output group to a 128-lane boundary: static slices
        # become free view offsets and the output store is an unmasked vst.
        we = jnp.pad(we, ((0, 0), (0, 0), (0, d_out_pad - d_out)))
    we_flat = jnp.transpose(we, (1, 0, 2)).reshape(d, num_experts * d_out_pad)
    return dict(
        gate_w=gate_w.astype(jnp.float32),
        gate_b=gate_b.reshape(1, num_experts).astype(jnp.float32),
        we_flat=we_flat.astype(compute_dtype),
        num_experts=num_experts, d_in=d, d_out=d_out, d_out_pad=d_out_pad,
        compute_dtype=jnp.dtype(compute_dtype),
    )


def threshold_moe_forward(inputs, gate_w=None, gate_b=None, expert_w=None,
                          threshold=0.0, patch_h=None, patch_w=None, *,
                          tile_m=512, compute_dtype=jnp.bfloat16,
                          experts_per_block=None, packed_params=None):
    """ThresholdMoeLayer.forward (lora_type='linear').

    inputs: (..., D).  Pass either raw (gate_w, gate_b, expert_w) or a cached
    `packed_params` from prepare_moe_params (preferred: hoists the O(E*D*D_out)
    repack out of the forward path).  patch_h / patch_w are accepted but unused
    on the linear-expert path (same as the PyTorch module).
    """
    del patch_h, patch_w
    if packed_params is None:
        packed_params = prepare_moe_params(gate_w, gate_b, expert_w, compute_dtype)
    p = packed_params
    D, E = p["d_in"], p["num_experts"]
    d_out, d_out_pad = p["d_out"], p["d_out_pad"]
    matmul_dtype = p["compute_dtype"]

    flat = inputs.reshape(-1, D)
    N = flat.shape[0]

    if experts_per_block is not None:
        assert E % experts_per_block == 0, "experts_per_block must divide num_experts"

    x_bpe = jnp.dtype(flat.dtype).itemsize
    w_bpe = jnp.dtype(matmul_dtype).itemsize
    out_bpe = jnp.dtype(inputs.dtype).itemsize
    tm, eblk, n_eblk, vmem_est, vmem_cap = _plan_tiles(
        N, D, d_out_pad, E, x_bpe, w_bpe, out_bpe, tile_m, experts_per_block)

    n_pad = _round_up(max(N, 1), tm)
    if n_pad != N:
        flat = jnp.pad(flat, ((0, n_pad - N), (0, 0)))

    vmem_limit = None
    if vmem_est > 8 * 2 ** 20:
        vmem_limit = min(int(vmem_cap * 0.8), max(int(vmem_est * 1.6), 24 * 2 ** 20))

    out_shape = jax.ShapeDtypeStruct((n_pad, d_out_pad), inputs.dtype)

    if n_eblk == 1:
        # Fully resident expert stack: 1-D token grid, constants single-buffered.
        kernel = functools.partial(
            _moe_kernel_resident, threshold=float(threshold), num_experts=E,
            d_out_pad=d_out_pad, matmul_dtype=matmul_dtype)
        out = pl.pallas_call(
            kernel,
            out_shape=out_shape,
            grid_spec=pltpu.PrefetchScalarGridSpec(
                num_scalar_prefetch=0,
                grid=(n_pad // tm,),
                in_specs=[
                    pl.BlockSpec((tm, D), lambda i: (i, 0)),
                    _const_spec((D, E), lambda i: (0, 0)),
                    _const_spec((1, E), lambda i: (0, 0)),
                    _const_spec((D, E * d_out_pad), lambda i: (0, 0)),
                ],
                out_specs=pl.BlockSpec((tm, d_out_pad), lambda i: (i, 0)),
            ),
            compiler_params=pltpu.CompilerParams(
                dimension_semantics=("parallel",),
                vmem_limit_bytes=vmem_limit),
        )(flat, p["gate_w"], p["gate_b"], p["we_flat"])
    else:
        # Expert-blocked reduction axis ("arbitrary"): keeps the token tile
        # large when the full (D, E*D_out_pad) stack cannot stay VMEM-resident
        # (e.g. v7x: 64 MiB per TC).  Accumulates into an f32 VMEM scratch.
        kernel = functools.partial(
            _moe_kernel_blocked, threshold=float(threshold),
            experts_per_block=eblk, d_out_pad=d_out_pad, matmul_dtype=matmul_dtype)
        out = pl.pallas_call(
            kernel,
            out_shape=out_shape,
            grid_spec=pltpu.PrefetchScalarGridSpec(
                num_scalar_prefetch=0,
                grid=(n_pad // tm, n_eblk),
                in_specs=[
                    pl.BlockSpec((tm, D), lambda i, j: (i, 0)),
                    _const_spec((D, E), lambda i, j: (0, 0)),
                    _const_spec((1, E), lambda i, j: (0, 0)),
                    pl.BlockSpec((D, eblk * d_out_pad), lambda i, j: (0, j)),
                ],
                out_specs=pl.BlockSpec((tm, d_out_pad), lambda i, j: (i, 0)),
                scratch_shapes=[
                    pltpu.VMEM((tm, E), jnp.float32),          # gate weights
                    pltpu.VMEM((tm, d_out_pad), jnp.float32),  # f32 accumulator
                ],
            ),
            compiler_params=pltpu.CompilerParams(
                dimension_semantics=("parallel", "arbitrary"),
                vmem_limit_bytes=vmem_limit),
        )(flat, p["gate_w"], p["gate_b"], p["we_flat"])

    return out[:N, :d_out].reshape(*inputs.shape[:-1], d_out)


# ---------------------------------------------------------------------------
# Plain-JAX reference + balance loss (module side-effect; not the hot path)
# ---------------------------------------------------------------------------
def balance_loss_ref(inputs, gate_w, gate_b, threshold, num_experts):
    # Switch-Transformer style load-balance loss, as in get_balance_loss.
    flat = inputs.reshape(-1, inputs.shape[-1])
    probs = jax.nn.softmax(flat @ gate_w + gate_b, axis=-1)
    sel = (probs >= threshold).astype(jnp.float32)
    n = flat.shape[0]
    frac = jnp.sum(sel, axis=0) / n
    p = jnp.sum(probs, axis=0) / n
    return num_experts * jnp.sum(frac * p)


def moe_reference(inputs, gate_w, gate_b, expert_w, threshold):
    flat = inputs.reshape(-1, inputs.shape[-1])
    probs = jax.nn.softmax(flat @ gate_w + gate_b, axis=-1)
    sel = (probs >= threshold).astype(jnp.float32)
    w = probs * sel
    ws = jnp.sum(w, axis=-1, keepdims=True)
    ws = jnp.where(ws == 0.0, jnp.ones_like(ws), ws)
    w = w / ws
    expert_outs = jnp.einsum("nd,edo->neo", flat, expert_w)
    out = jnp.einsum("ne,neo->no", w, expert_outs)
    return out.reshape(*inputs.shape[:-1], expert_w.shape[-1])


if __name__ == "__main__":
    key = jax.random.PRNGKey(0)
    k1, k2, k3, k4 = jax.random.split(key, 4)

    B, S, D = 2, 8, 32          # inputs (..., D) -> N = 16 tokens
    E, D_out = 4, 32            # 4 experts, linear experts D -> D_out
    threshold = 0.2

    inputs = jax.random.normal(k1, (B, S, D), dtype=jnp.float32)
    gate_w = jax.random.normal(k2, (D, E), dtype=jnp.float32) * 0.1
    gate_b = jax.random.normal(k3, (E,), dtype=jnp.float32) * 0.01
    expert_w = jax.random.normal(k4, (E, D, D_out), dtype=jnp.float32) * (1.0 / D ** 0.5)

    ref = moe_reference(inputs, gate_w, gate_b, expert_w, threshold)

    # 1) exact f32 path (resident kernel, weights packed once at "init").
    params_f32 = prepare_moe_params(gate_w, gate_b, expert_w,
                                    compute_dtype=jnp.float32)
    out_f32 = threshold_moe_forward(inputs, threshold=threshold,
                                    patch_h=4, patch_w=4,
                                    packed_params=params_f32)
    out_f32 = jax.block_until_ready(out_f32)
    assert out_f32.shape == (B, S, D_out)
    assert jnp.allclose(out_f32, ref, atol=1e-4, rtol=1e-4), float(
        jnp.max(jnp.abs(out_f32 - ref)))

    # 2) default path: bf16 expert matmul (MXU), f32 gate/selection in-kernel.
    out_bf16 = threshold_moe_forward(inputs, gate_w, gate_b, expert_w, threshold,
                                     patch_h=4, patch_w=4)
    out_bf16 = jax.block_until_ready(out_bf16)
    assert out_bf16.shape == (B, S, D_out)
    assert bool(jnp.all(jnp.isfinite(out_bf16)))
    assert jnp.allclose(out_bf16, ref, atol=3e-2, rtol=3e-2), float(
        jnp.max(jnp.abs(out_bf16 - ref)))

    # 3) expert-blocked reduction path (what large stacks use on v7x), f32.
    out_blk = threshold_moe_forward(inputs, threshold=threshold,
                                    packed_params=params_f32,
                                    experts_per_block=2)
    out_blk = jax.block_until_ready(out_blk)
    assert out_blk.shape == (B, S, D_out)
    assert jnp.allclose(out_blk, ref, atol=1e-4, rtol=1e-4), float(
        jnp.max(jnp.abs(out_blk - ref)))

    # balance-loss side effect of the module (plain-JAX helper, not fused).
    _ = jax.block_until_ready(balance_loss_ref(inputs, gate_w, gate_b, threshold, E))

    print("KERNEL_OK")
</pallas_src>

<mosaic_0001>
module attributes {stable_mosaic.version = 11 : i64} {
  func.func @_moe_kernel_resident(%arg0: i32, %arg1: memref<16x32xf32, #tpu.memory_space<vmem>>, %arg2: memref<32x4xf32, #tpu.memory_space<vmem>>, %arg3: memref<1x4xf32, #tpu.memory_space<vmem>>, %arg4: memref<32x512xf32, #tpu.memory_space<vmem>>, %arg5: memref<16x128xf32, #tpu.memory_space<vmem>>) attributes {dimension_semantics = [#tpu.dimension_semantics<parallel>], iteration_bounds = array<i64: 1>, scalar_prefetch = 0 : i64, scratch_operands = 0 : i64, tpu.core_type = #tpu.core_type<tc>, window_params = [{transform_indices = @transform_0, window_bounds = array<i64: 16, 32>}, {pipeline_mode = #tpu.pipeline_mode<synchronous>, transform_indices = @transform_1, window_bounds = array<i64: 32, 4>}, {pipeline_mode = #tpu.pipeline_mode<synchronous>, transform_indices = @transform_2, window_bounds = array<i64: 1, 4>}, {pipeline_mode = #tpu.pipeline_mode<synchronous>, transform_indices = @transform_3, window_bounds = array<i64: 32, 512>}, {transform_indices = @transform_4, window_bounds = array<i64: 16, 128>}]} {
    %c0 = arith.constant 0 : index
    %c0_0 = arith.constant 0 : index
    %0 = vector.load %arg1[%c0, %c0_0] : memref<16x32xf32, #tpu.memory_space<vmem>>, vector<16x32xf32>
    %c0_1 = arith.constant 0 : index
    %c0_2 = arith.constant 0 : index
    %1 = vector.load %arg2[%c0_1, %c0_2] : memref<32x4xf32, #tpu.memory_space<vmem>>, vector<32x4xf32>
    %c0_3 = arith.constant 0 : index
    %c0_4 = arith.constant 0 : index
    %2 = vector.load %arg3[%c0_3, %c0_4] : memref<1x4xf32, #tpu.memory_space<vmem>>, vector<1x4xf32>
    %cst = arith.constant dense<0.000000e+00> : vector<16x4xf32>
    %3 = tpu.matmul %0, %1, %cst {dimension_numbers = #tpu.dot_dimension_numbers<[1], [0], [0], [1], [0, 0, 1, 1], [], []>} : vector<16x32xf32>, vector<32x4xf32>, vector<16x4xf32> -> vector<16x4xf32>
    %4 = vector.broadcast %2 : vector<1x4xf32> to vector<16x4xf32>
    %5 = arith.addf %3, %4 : vector<16x4xf32>
    %cst_5 = arith.constant dense<0xFF800000> : vector<16xf32>
    %6 = vector.multi_reduction <maximumf>, %5, %cst_5 [1] : vector<16x4xf32> to vector<16xf32>
    %7 = vector.shape_cast %6 : vector<16xf32> to vector<16x1xf32>
    %8 = vector.broadcast %7 : vector<16x1xf32> to vector<16x4xf32>
    %9 = arith.subf %5, %8 : vector<16x4xf32>
    %10 = math.exp %9 : vector<16x4xf32>
    %cst_6 = arith.constant dense<0.000000e+00> : vector<16xf32>
    %11 = vector.multi_reduction <add>, %10, %cst_6 [1] : vector<16x4xf32> to vector<16xf32>
    %12 = vector.shape_cast %11 : vector<16xf32> to vector<16x1xf32>
    %13 = vector.broadcast %12 : vector<16x1xf32> to vector<16x4xf32>
    %14 = arith.divf %10, %13 : vector<16x4xf32>
    %cst_7 = arith.constant 2.000000e-01 : f32
    %15 = vector.broadcast %cst_7 : f32 to vector<16x4xf32>
    %16 = arith.cmpf oge, %14, %15 : vector<16x4xf32>
    %17 = arith.extui %16 : vector<16x4xi1> to vector<16x4xi32>
    %18 = arith.sitofp %17 : vector<16x4xi32> to vector<16x4xf32>
    %19 = arith.mulf %14, %18 : vector<16x4xf32>
    %cst_8 = arith.constant dense<0.000000e+00> : vector<16xf32>
    %20 = vector.multi_reduction <add>, %19, %cst_8 [1] : vector<16x4xf32> to vector<16xf32>
    %21 = vector.shape_cast %20 : vector<16xf32> to vector<16x1xf32>
    %cst_9 = arith.constant 0.000000e+00 : f32
    %22 = vector.broadcast %cst_9 : f32 to vector<16x1xf32>
    %23 = arith.cmpf oeq, %21, %22 : vector<16x1xf32>
    %cst_10 = arith.constant 1.000000e+00 : f32
    %24 = vector.broadcast %cst_10 : f32 to vector<16x1xf32>
    %25 = arith.select %23, %24, %21 : vector<16x1xi1>, vector<16x1xf32>
    %26 = vector.broadcast %25 : vector<16x1xf32> to vector<16x4xf32>
    %27 = arith.divf %19, %26 : vector<16x4xf32>
    %c0_11 = arith.constant 0 : index
    %c0_12 = arith.constant 0 : index
    %28 = vector.load %arg4[%c0_11, %c0_12] : memref<32x512xf32, #tpu.memory_space<vmem>>, vector<32x512xf32>
    %cst_13 = arith.constant dense<0.000000e+00> : vector<16x512xf32>
    %29 = tpu.matmul %0, %28, %cst_13 {dimension_numbers = #tpu.dot_dimension_numbers<[1], [0], [0], [1], [0, 0, 1, 1], [], []>} : vector<16x32xf32>, vector<32x512xf32>, vector<16x512xf32> -> vector<16x512xf32>
    %30 = vector.extract_strided_slice %27 {offsets = [0, 0], sizes = [16, 1], strides = [1, 1]} : vector<16x4xf32> to vector<16x1xf32>
    %31 = vector.extract_strided_slice %29 {offsets = [0, 0], sizes = [16, 128], strides = [1, 1]} : vector<16x512xf32> to vector<16x128xf32>
    %32 = vector.broadcast %30 : vector<16x1xf32> to vector<16x128xf32>
    %33 = arith.mulf %32, %31 : vector<16x128xf32>
    %34 = vector.extract_strided_slice %27 {offsets = [0, 1], sizes = [16, 1], strides = [1, 1]} : vector<16x4xf32> to vector<16x1xf32>
    %35 = vector.extract_strided_slice %29 {offsets = [0, 128], sizes = [16, 128], strides = [1, 1]} : vector<16x512xf32> to vector<16x128xf32>
    %36 = vector.broadcast %34 : vector<16x1xf32> to vector<16x128xf32>
    %37 = arith.mulf %36, %35 : vector<16x128xf32>
    %38 = vector.extract_strided_slice %27 {offsets = [0, 2], sizes = [16, 1], strides = [1, 1]} : vector<16x4xf32> to vector<16x1xf32>
    %39 = vector.extract_strided_slice %29 {offsets = [0, 256], sizes = [16, 128], strides = [1, 1]} : vector<16x512xf32> to vector<16x128xf32>
    %40 = vector.broadcast %38 : vector<16x1xf32> to vector<16x128xf32>
    %41 = arith.mulf %40, %39 : vector<16x128xf32>
    %42 = vector.extract_strided_slice %27 {offsets = [0, 3], sizes = [16, 1], strides = [1, 1]} : vector<16x4xf32> to vector<16x1xf32>
    %43 = vector.extract_strided_slice %29 {offsets = [0, 384], sizes = [16, 128], strides = [1, 1]} : vector<16x512xf32> to vector<16x128xf32>
    %44 = vector.broadcast %42 : vector<16x1xf32> to vector<16x128xf32>
    %45 = arith.mulf %44, %43 : vector<16x128xf32>
    %46 = arith.addf %33, %37 : vector<16x128xf32>
    %47 = arith.addf %41, %45 : vector<16x128xf32>
    %48 = arith.addf %46, %47 : vector<16x128xf32>
    %c0_14 = arith.constant 0 : index
    %c0_15 = arith.constant 0 : index
    %49 = vector.load %arg5[%c0_14, %c0_15] : memref<16x128xf32, #tpu.memory_space<vmem>>, vector<16x128xf32>
    tpu.vector_store %arg5[%c0_14, %c0_15], %48 {strides = array<i32>} : memref<16x128xf32, #tpu.memory_space<vmem>>, vector<16x128xf32>,
    return
  }
  func.func @transform_0(%arg0: i32) -> (i32, i32) {
    %c0_i32 = arith.constant 0 : i32
    %c0_i32_0 = arith.constant 0 : i32
    return %arg0, %c0_i32 : i32, i32
  }
  func.func @transform_1(%arg0: i32) -> (i32, i32) {
    %c0_i32 = arith.constant 0 : i32
    %c0_i32_0 = arith.constant 0 : i32
    %c0_i32_1 = arith.constant 0 : i32
    return %c0_i32, %c0_i32_0 : i32, i32
  }
  func.func @transform_2(%arg0: i32) -> (i32, i32) {
    %c0_i32 = arith.constant 0 : i32
    %c0_i32_0 = arith.constant 0 : i32
    %c0_i32_1 = arith.constant 0 : i32
    return %c0_i32, %c0_i32_0 : i32, i32
  }
  func.func @transform_3(%arg0: i32) -> (i32, i32) {
    %c0_i32 = arith.constant 0 : i32
    %c0_i32_0 = arith.constant 0 : i32
    %c0_i32_1 = arith.constant 0 : i32
    return %c0_i32, %c0_i32_0 : i32, i32
  }
  func.func @transform_4(%arg0: i32) -> (i32, i32) {
    %c0_i32 = arith.constant 0 : i32
    %c0_i32_0 = arith.constant 0 : i32
    return %arg0, %c0_i32 : i32, i32
  }
}

</mosaic_0001>

<bundles_post_ra>
// kernel: tpu_custom_call.1
= control target key start
LH: loop header
LB: loop body
LE: loop exit
PB: predicated region body
PF: predicated region fallthrough
CT: control target
= control target key end

     0   :  { %9 = vsyncpa [#allocation3], 0  ;;  %s645_s0 = inlined_call_operand.vmem [shape: f32[16,32], index: 0, kind: input, shape index: {}]   ;;  %s646_s1 = inlined_call_operand.vmem [shape: f32[32,4], index: 1, kind: input, shape index: {}]   ;;  %s647_s2 = inlined_call_operand.vmem [shape: f32[1,4], index: 2, kind: input, shape index: {}]   ;;  %s648_s3 = inlined_call_operand.hbm [shape: f32[32,512], index: 3, kind: input, shape index: {}]   ;;  %s649_s4 = inlined_call_operand.hbm [shape: f32[16,128], index: 4, kind: output, shape index: {}]  }
   0x1   :  { %10 = vsyncpa [#allocation4], 0  ;;  %s542_s15 = smov [#allocation2]   ;;  %s494_s19 = scalar_lea.hbm %s648_s3, 2048 }
   0x2   :  { %s22_s16 = sshll.u32 %s542_s15, 4  ;;  %p495_p0 = scmp.ne.s32.totalorder %s648_s3, %s494_s19  ;;  %s23_s16 = int_to_ptr.vmem [resolvable:$true] %s22_s16 }
   0x3   :  { %p498_p1 = scmp.lt.u32.totalorder %s494_s19, %s648_s3 }
   0x5   :  { %p500_p2 = pnand %p498_p1, %p495_p0 }
   0x7   :  { %503 = shalt.err (!%p500_p2)
}
   0x8   :  { %s504_s24 = scalar_lea.vmem %s23_s16, 2048  ;;  %p509_p4 = scmp.lt.s32.totalorder %s23_s16, %s23_s16 }
   0x9   :  { %p505_p3 = scmp.ne.s32.totalorder %s23_s16, %s504_s24  ;;  %p510_p5 = scmp.lt.s32.totalorder %s504_s24, %s504_s24 }
   0xb   :  { %p511_p6 = por %p510_p5, %p509_p4 }
   0xd   :  { %p512_p7 = pnand %p511_p6, %p505_p3 }
   0xf   :  { %515 = shalt.err (!%p512_p7)
}
  0x10   :  { %s543_s25 = smov 512   ;;  %s544_s26 = smov 32  }
  0x11   :  { %28 = dma.hbm_to_vmem [thread:$0]  %s648_s3, 2048, %s23_s16, [#allocation3], %s543_s25, %s543_s25, %s544_s26  }
  0x12   :  { %538 = dma.done.wait [#allocation3], 2048  }
  0x13   :  { %539 = vsyncadd [#allocation3], 4294965248  ;;  %vm45_vm0 = vcmask 261120   ;;  %v34_v0 = vld [vmem:[%s646_s1] sm:$0xff]  ;;  %v35_v1 = vld [vmem:[%s646_s1 + $0x8] sm:$0xff]  ;;  %vm127_vm1 = vcmask 31744  }
  0x14   :  { %v36_v2 = vld [vmem:[%s646_s1 + $0x10] sm:$0xff]  ;;  %v435_v3 = vpack.c.bf16 %v35_v1, %v34_v0  ;;  %v37_v4 = vld [vmem:[%s646_s1 + $0x18] sm:$0xff]  ;;  %v605_v5 = vld [vmem:[%s645_s0] sm:$0xff]  ;;  %v545_v25 = vmov 0.0   ;;  %v546_v62 = vmov 0  }
  0x15   :  { %v439_v6 = vpack.c.bf16 %v37_v4, %v36_v2  ;;  %432 = vmatprep.mubr.msk.f32.mxu0 %vm45_vm0, %v605_v5  ;;  %v612_v7 = vld [vmem:[%s645_s0 + $0x8] sm:$0xff]  ;;  %v409_v8 = vld [vmem:[%s647_s2] ss:$0 sm:$0xff]  ;;  %252 = vmatprep.mubr.f32.mxu1 %v545_v25  ;;  %v175_v37 = vld [vmem:[#allocation2 + $0x18] sm:$0xff]  ;;  %s550_s0 = smov [#allocation5]  }
  0x16   :  { %436 = vmatprep.subr.bf16.mxu0 %v435_v3  ;;  %v173_v26 = vld [vmem:[#allocation2 + $0x8] sm:$0xff]  ;;  %v172_v28 = vld [vmem:[#allocation2] sm:$0xff]  ;;  %v179_v38 = vld [vmem:[#allocation2 + $0x38] sm:$0xff]  ;;  %474 = vset.pattern.permute.xlu0 %v546_v62  ;;  %s397_s2 = sshll.u32 %s550_s0, 4  ;;  %s398_s2 = int_to_ptr.vmem [resolvable:$true] %s397_s2 }
  0x17   :  { %438 = vmatpush3.bf16.msra.mxu0 %v435_v3  ;;  %v177_v27 = vld [vmem:[#allocation2 + $0x28] sm:$0xff]  ;;  %v176_v30 = vld [vmem:[#allocation2 + $0x20] sm:$0xff]  ;;  %v174_v39 = vld [vmem:[#allocation2 + $0x10] sm:$0xff]  ;;  %v451_v42 = vpack.c.bf16 %v179_v38, %v175_v37  ;;  %475 = vset.pattern.permute.xlu1 %v546_v62  ;;  %s516_s15 = scalar_lea.vmem %s398_s2, 256  ;;  %p521_p9 = scmp.lt.s32.totalorder %s398_s2, %s398_s2 }
  0x18   :  { %440 = vmatprep.subr.bf16.mxu0 %v439_v6  ;;  %v443_v29 = vpack.c.bf16 %v177_v27, %v173_v26  ;;  %v181_v31 = vld [vmem:[#allocation2 + $0x48] sm:$0xff]  ;;  %v445_v33 = vpack.c.bf16 %v176_v30, %v172_v28  ;;  %v180_v35 = vld [vmem:[#allocation2 + $0x40] sm:$0xff]  ;;  %v178_v40 = vld [vmem:[#allocation2 + $0x30] sm:$0xff]  ;;  %p517_p8 = scmp.ne.s32.totalorder %s398_s2, %s516_s15  ;;  %p522_p10 = scmp.lt.s32.totalorder %s516_s15, %s516_s15 }
  0x19   :  { %v185_v32 = vld [vmem:[#allocation2 + $0x68] sm:$0xff]  ;;  %v184_v36 = vld [vmem:[#allocation2 + $0x60] sm:$0xff]  ;;  %v183_v43 = vld [vmem:[#allocation2 + $0x58] sm:$0xff]  ;;  %v453_v45 = vpack.c.bf16 %v178_v40, %v174_v39 }
  0x1a   :  { %v447_v34 = vpack.c.bf16 %v185_v32, %v181_v31  ;;  %444 = vmatprep.subr.bf16.mxu1 %v443_v29  ;;  %v449_v41 = vpack.c.bf16 %v184_v36, %v180_v35  ;;  %v187_v44 = vld [vmem:[#allocation2 + $0x78] sm:$0xff]  ;;  %v182_v47 = vld [vmem:[#allocation2 + $0x50] sm:$0xff]  ;;  %p523_p11 = por %p522_p10, %p521_p9 }
  0x1b   :  { %442 = vmatpush3.bf16.msra.mxu0 %v439_v6  ;;  %446 = vmatpush1.bf16.msra.mxu1 %v445_v33  ;;  %v455_v46 = vpack.c.bf16 %v187_v44, %v183_v43  ;;  %v186_v48 = vld [vmem:[#allocation2 + $0x70] sm:$0xff] }
  0x1c   :  { %448 = vmatprep.subr.bf16.mxu1 %v447_v34  ;;  %452 = vmatprep.subr.bf16.mxu0 %v451_v42  ;;  %v457_v49 = vpack.c.bf16 %v186_v48, %v182_v47  ;;  %p524_p12 = pnand %p523_p11, %p517_p8 }
  0x1e   :  { %433 = vmatmul.mubr.msk.f32.vlgmr.msra.gmra.mrb[0].mxu0 %vm45_vm0, %v612_v7 }
  0x1f   :  { %329 = vmatprep.mubr.f32.mxu0 %v545_v25  ;;  %454 = vmatpush1.bf16.msra.mxu0 %v453_v45 }
  0x20   :  { %450 = vmatpush1.bf16.msra.mxu1 %v449_v41  ;;  %456 = vmatprep.subr.bf16.mxu0 %v455_v46 }
  0x21   :  { %459 = vmatprep.subr.bf16.mxu1 %v451_v42 }
  0x23   :  { %414 = vmatmul.mubr.msk.f32.vlgmr.msra.gmra.mrb[0].mxu1 %vm45_vm0, %v605_v5  ;;  %458 = vmatpush1.bf16.msra.mxu0 %v457_v49 }
  0x24   :  { %258 = vmatprep.mubr.f32.mxu1 %v545_v25  ;;  %461 = vmatpush1.bf16.msra.mxu1 %v453_v45 }
  0x25   :  { %460 = vmatprep.subr.bf16.mxu1 %v455_v46 }
  0x26   :  { %416 = vmatmul.mubr.msk.f32.vlgmr.msra.gmra.mrb[2].mxu0 %vm45_vm0, %v605_v5 }
  0x27   :  { %415 = vmatmul.mubr.msk.f32.gmra.mrb[2].mxu1 %vm45_vm0, %v612_v7 }
  0x28   :  { %462 = vmatpush1.bf16.msra.mxu1 %v457_v49  ;;  %335 = vmatprep.mubr.f32.mxu1 %v545_v25 }
  0x2b   :  { %417 = vmatmul.mubr.msk.f32.vlgmr.msra.gmra.mrb[4].mxu1 %vm45_vm0, %v612_v7 }
  0xf1   :  { %v434_v9 = vpop.f32.mrb[0].mxu0 }
  0xf2   :  { %v118_v10 = vpop.f32.mrb[1].mxu0  ;;  %v124_v12 = vadd.f32 %v434_v9, %v409_v8 }
  0xf3   :  { %v119_v11 = vadd.f32 %v409_v8, %v118_v10 }
  0xf4   :  { %v131_v14 = vsel %vm127_vm1, %v124_v12, -inf }
  0xf5   :  { %v128_v13 = vsel %vm127_vm1, %v119_v11, -inf }
  0xf6   :  { %129 = vmax.xlane.f32.xlu0 %v128_v13  ;;  %v254_v63 = vpop.f32.mrb[0].mxu1 }
  0xf7   :  { %v256_v6 = vpop.f32.mrb[1].mxu1 }
  0xfa   :  { %132 = vmax.xlane.f32.xlu0 %v131_v14  ;;  %v260_v8 = vpop.f32.mrb[2].mxu1  ;;  %v549_v14 = vmov 2  }
  0xfb   :  { %v262_v10 = vpop.f32.mrb[3].mxu1 }
  0xfe   :  { %v337_v13 = vpop.f32.mrb[4].mxu1 }
 0x183   :  { %v130_v15 = vpop.xlane.xlu0 %129 }
 0x184   :  { %v134_v16 = vsub.f32 %v119_v11, %v130_v15  ;;  %v547_v11 = vmov 3   ;;  %v331_v15 = vpop.f32.mrb[2].mxu0 }
 0x186   :  { %v136_v17 = vmul.f32 1.442695, %v134_v16  ;;  %v333_v16 = vpop.f32.mrb[3].mxu0 }
 0x187   :  { %v133_v18 = vpop.xlane.xlu0 %132 }
 0x188   :  { %482 = vpow2.f32 %v136_v17  ;;  %v135_v19 = vsub.f32 %v124_v12, %v133_v18  ;;  %v548_v12 = vmov 1   ;;  %v339_v17 = vpop.f32.mrb[5].mxu1 }
 0x18a   :  { %v138_v20 = vmul.f32 1.442695, %v135_v19 }
 0x18c   :  { %484 = vpow2.f32 %v138_v20 }
 0x192   :  { %v483_v21 = vpop.eup %482 }
 0x193   :  { %v140_v22 = vsel %vm127_vm1, %v483_v21, 0.0 }
 0x194   :  { %141 = vadd.xlane.f32.xlu1 %v140_v22 }
 0x196   :  { %v485_v23 = vpop.eup %484 }
 0x197   :  { %v143_v24 = vsel %vm127_vm1, %v485_v23, 0.0 }
 0x198   :  { %144 = vadd.xlane.f32.xlu1 %v143_v24 }
 0x221   :  { %v142_v50 = vpop.xlane.xlu1 %141 }
 0x222   :  { %486 = vrcp.f32 %v142_v50 }
 0x225   :  { %v145_v51 = vpop.xlane.xlu1 %144 }
 0x226   :  { %488 = vrcp.f32 %v145_v51 }
 0x22c   :  { %v487_v52 = vpop.eup %486 }
 0x22d   :  { %v147_v53 = vmul.f32 %v487_v52, %v483_v21 }
 0x22f   :  { %vm150_vm2 = vcmp.ge.f32.partialorder %v147_v53, 0.2 }
 0x230   :  { %v489_v54 = vpop.eup %488  ;;  %v412_v55 = vsel %vm150_vm2, 1.0, %v545_v25 }
 0x231   :  { %v156_v56 = vmul.f32 %v412_v55, %v147_v53  ;;  %v149_v57 = vmul.f32 %v489_v54, %v485_v23 }
 0x233   :  { %v158_v58 = vsel %vm127_vm1, %v156_v56, 0.0  ;;  %vm151_vm3 = vcmp.ge.f32.partialorder %v149_v57, 0.2 }
 0x234   :  { %159 = vadd.xlane.f32.xlu0 %v158_v58  ;;  %v413_v59 = vsel %vm151_vm3, 1.0, %v545_v25 }
 0x235   :  { %v157_v60 = vmul.f32 %v413_v59, %v149_v57 }
 0x237   :  { %v161_v61 = vsel %vm127_vm1, %v157_v60, 0.0 }
 0x238   :  { %162 = vadd.xlane.f32.xlu1 %v161_v61 }
 0x2c1   :  { %v160_v0 = vpop.xlane.xlu0 %159 }
 0x2c2   :  { %vm164_vm4 = vcmp.eq.f32.partialorder %v160_v0, 0.0 }
 0x2c3   :  { %v166_v1 = vsel %vm164_vm4, 1.0, %v160_v0 }
 0x2c4   :  { %490 = vrcp.f32 %v166_v1 }
 0x2c5   :  { %v163_v2 = vpop.xlane.xlu1 %162 }
 0x2c6   :  { %vm165_vm5 = vcmp.eq.f32.partialorder %v163_v2, 0.0 }
 0x2c7   :  { %v167_v3 = vsel %vm165_vm5, 1.0, %v163_v2 }
 0x2c8   :  { %492 = vrcp.f32 %v167_v3 }
 0x2ce   :  { %v491_v4 = vpop.eup %490 }
 0x2cf   :  { %v169_v5 = vmul.f32 %v491_v4, %v156_v56 }
 0x2d1   :  { %344 = vperm.xlu0 %474, %v169_v5  }
 0x2d2   :  { %v493_v7 = vpop.eup %492 }
 0x2d3   :  { %v171_v9 = vmul.f32 %v493_v7, %v157_v60 }
 0x2d5   :  { %349 = vperm.xlu1 %475, %v171_v9   ;;  %481 = vset.pattern.permute.xlu0 %v547_v11 }
 0x2d9   :  { %476 = vset.pattern.permute.xlu1 %v548_v12 }
 0x2da   :  { %359 = vperm.xlu1 %476, %v171_v9  }
 0x2de   :  { %477 = vset.pattern.permute.xlu1 %v549_v14 }
 0x2df   :  { %369 = vperm.xlu1 %477, %v171_v9  }
 0x2e3   :  { %478 = vset.pattern.permute.xlu1 %v548_v12 }
 0x2e4   :  { %355 = vperm.xlu1 %478, %v169_v5  }
 0x2e8   :  { %479 = vset.pattern.permute.xlu1 %v549_v14 }
 0x2e9   :  { %365 = vperm.xlu1 %479, %v169_v5  }
 0x2ed   :  { %480 = vset.pattern.permute.xlu1 %v547_v11 }
 0x2ee   :  { %375 = vperm.xlu1 %480, %v169_v5  }
 0x2f2   :  { %379 = vperm.xlu1 %480, %v171_v9  }
 0x350   :  { %v345_v24 = vpop.permute.xlu0 %344 }
 0x351   :  { %v352_v26 = vmul.f32 %v345_v24, %v254_v63 }
 0x354   :  { %v350_v18 = vpop.permute.xlu1 %349 }
 0x355   :  { %v353_v20 = vmul.f32 %v350_v18, %v260_v8 }
 0x359   :  { %v360_v19 = vpop.permute.xlu1 %359 }
 0x35a   :  { %v363_v21 = vmul.f32 %v360_v19, %v262_v10 }
 0x35c   :  { %v385_v22 = vadd.f32 %v363_v21, %v353_v20 }
 0x35e   :  { %v370_v23 = vpop.permute.xlu1 %369 }
 0x35f   :  { %v373_v35 = vmul.f32 %v370_v23, %v337_v13 }
 0x363   :  { %v356_v25 = vpop.permute.xlu1 %355 }
 0x364   :  { %v362_v27 = vmul.f32 %v356_v25, %v256_v6 }
 0x366   :  { %v384_v28 = vadd.f32 %v362_v27, %v352_v26 }
 0x368   :  { %v366_v29 = vpop.permute.xlu1 %365 }
 0x369   :  { %v372_v31 = vmul.f32 %v366_v29, %v331_v15 }
 0x36d   :  { %v376_v30 = vpop.permute.xlu1 %375 }
 0x36e   :  { %v382_v32 = vmul.f32 %v376_v30, %v333_v16 }
 0x370   :  { %v386_v33 = vadd.f32 %v382_v32, %v372_v31 }
 0x371   :  { %v380_v34 = vpop.permute.xlu1 %379 }
 0x372   :  { %v388_v36 = vadd.f32 %v386_v33, %v384_v28  ;;  %v383_v37 = vmul.f32 %v380_v34, %v339_v17 }
 0x374   :  { %390 = vst [vmem:[#allocation5] sm:$0xff] %v388_v36  ;;  %v387_v38 = vadd.f32 %v383_v37, %v373_v35 }
 0x376   :  { %v389_v39 = vadd.f32 %v387_v38, %v385_v22 }
 0x378   :  { %391 = vst [vmem:[#allocation5 + $0x8] sm:$0xff] %v389_v39 }
 0x379   :  { %527 = shalt.err (!%p524_p12)
}
 0x37a   :  { %s528_s18 = scalar_lea.hbm %s649_s4, 256 }
 0x37b   :  { %p529_p13 = scmp.ne.s32.totalorder %s649_s4, %s528_s18  ;;  %p532_p0 = scmp.lt.u32.totalorder %s528_s18, %s649_s4 }
 0x37d   :  { %p534_p1 = pnand %p532_p0, %p529_p13 }
 0x37f   :  { %537 = shalt.err (!%p534_p1)
}
 0x380   :  { %s551_s23 = smov 128   ;;  %s552_s24 = smov 8  }
 0x381   :  { %403 = dma.vmem_to_hbm [thread:$0]  %s398_s2, 256, %s649_s4, [#allocation4], %s551_s23, %s551_s23, %s552_s24  }
 0x382   :  { %540 = dma.done.wait [#allocation4], 256  }
 0x383   :  { %541 = vsyncadd [#allocation4], 4294967040 }
 0x384   :  { %407 = vsyncpa [#allocation3], 1 }
 0x385   :  { %408 = vsyncpa [#allocation4], 1 }

</bundles_post_ra>
